<compile_context>
chip_gen: v7x
topology: tpu7x:2x2x1
jax: 0.10.0
libtpu: 0.0.40
codegen_flags: <defaults>
</compile_context>

<pallas_src>
import functools

import jax
import jax.numpy as jnp
from jax import lax
from jax.experimental import pallas as pl
from jax.experimental.pallas import tpu as pltpu


def gcn_kernel(x_ref, w1eff_ref, w2_ref, bias2_ref, o_ref, *,
               batch_block, num_state):
    # x_ref / o_ref : (batch_block * S, Np)  -- batch folded into the row axis
    # w1eff_ref     : (Np, Np)  = W1.T - I, zero padded to lane-dense Np
    # w2_ref        : (S, S)    conv2 weight
    # bias2_ref     : (S, Np)   = rowsum(W2) outer b1 (f32), zero padded
    S = num_state
    w1eff = w1eff_ref[...]
    w2 = w2_ref[...]
    bias2 = bias2_ref[...]

    if batch_block <= 4:
        # Small bb: one big conv1 matmul over all rows, unrolled conv2 loop.
        x2 = x_ref[...]                                              # (bb*S, Np)
        h = jnp.dot(x2, w1eff, preferred_element_type=jnp.float32)   # (bb*S, Np)
        for b in range(batch_block):                                 # static slices
            hb = h[b * S:(b + 1) * S, :]                             # (S, Np)
            ob = jnp.dot(w2, hb, preferred_element_type=jnp.float32) + bias2
            o_ref[b * S:(b + 1) * S, :] = jnp.maximum(ob, 0.0).astype(o_ref.dtype)
    else:
        # Large bb: per-batch fori_loop; only one (S, Np) tile of h is live.
        def body(b, carry):
            off = pl.multiple_of(b * S, S)
            xb = x_ref[pl.ds(off, S), :]                             # (S, Np)
            hb = jnp.dot(xb, w1eff, preferred_element_type=jnp.float32)
            ob = jnp.dot(w2, hb, preferred_element_type=jnp.float32) + bias2
            o_ref[pl.ds(off, S), :] = jnp.maximum(ob, 0.0).astype(o_ref.dtype)
            return carry

        lax.fori_loop(0, batch_block, body, 0)


def gcn_forward(x, w1, b1, w2, *, batch_block=None):
    """x: (B, S, N); w1: (N, N) conv1 weight; b1: (N,) conv1 bias; w2: (S, S)."""
    B, S, N = x.shape
    Np = pl.cdiv(N, 128) * 128            # lane-dense node axis

    # Collapse the grid at tiny sizes (launch-bound); keep >=2 grid steps once
    # there is real work so v7x's two TensorCores each take a "parallel" step.
    if batch_block is None:
        if B % 2 == 0 and B * S * Np >= (1 << 20):
            batch_block = B // 2
        else:
            batch_block = B
    assert B % batch_block == 0, "batch_block must divide B"
    grid = (B // batch_block,)

    f32 = jnp.float32
    # Fold residual + conv1 bias into the weights (wrapper-side, f32):
    #   out = relu(W2 @ (x @ (W1.T - I)) + rowsum(W2) ⊗ b1)
    w1eff = jnp.transpose(w1).astype(f32) - jnp.eye(N, dtype=f32)          # (N, N)
    bias2 = jnp.sum(w2.astype(f32), axis=1, keepdims=True) * \
        b1.astype(f32)[None, :]                                            # (S, N)

    # Zero-pad the node axis to Np (padded columns stay zero end-to-end).
    pad_n = Np - N
    if pad_n:
        x_p = jnp.pad(x, ((0, 0), (0, 0), (0, pad_n)))
        w1eff_p = jnp.pad(w1eff, ((0, pad_n), (0, pad_n)))
        bias2_p = jnp.pad(bias2, ((0, 0), (0, pad_n)))
    else:
        x_p, w1eff_p, bias2_p = x, w1eff, bias2

    x2d = x_p.reshape(B * S, Np)          # free row-major reshape
    w1eff_p = w1eff_p.astype(x.dtype)     # MXU input dtype (bf16-friendly)
    w2_in = w2.astype(x.dtype)            # MXU input dtype
    bias2_p = bias2_p.astype(f32)         # added to the f32 accumulator
    bb_rows = batch_block * S

    flops = 2 * B * S * Np * (Np + S)
    bytes_accessed = int(
        2 * x2d.size * x2d.dtype.itemsize
        + w1eff_p.size * w1eff_p.dtype.itemsize
        + w2_in.size * w2_in.dtype.itemsize
        + bias2_p.size * bias2_p.dtype.itemsize)

    kernel = functools.partial(gcn_kernel, batch_block=batch_block, num_state=S)

    out2d = pl.pallas_call(
        kernel,
        out_shape=jax.ShapeDtypeStruct((B * S, Np), x.dtype),
        grid_spec=pltpu.PrefetchScalarGridSpec(
            num_scalar_prefetch=0,
            grid=grid,
            in_specs=[
                pl.BlockSpec((bb_rows, Np), lambda i: (i, 0)),   # x slab
                pl.BlockSpec((Np, Np), lambda i: (0, 0)),        # W1eff
                pl.BlockSpec((S, S), lambda i: (0, 0)),          # W2
                pl.BlockSpec((S, Np), lambda i: (0, 0)),         # folded bias
            ],
            out_specs=pl.BlockSpec((bb_rows, Np), lambda i: (i, 0)),
        ),
        compiler_params=pltpu.CompilerParams(
            dimension_semantics=("parallel",),
        ),
        cost_estimate=pl.CostEstimate(
            flops=flops, transcendentals=0, bytes_accessed=bytes_accessed),
    )(x2d, w1eff_p, w2_in, bias2_p)

    out = out2d.reshape(B, S, Np)
    return out[:, :, :N] if pad_n else out


def gcn_reference(x, w1, b1, w2):
    # Pure-JAX reference matching the PyTorch module exactly.
    h = jnp.einsum("bsm,nm->bsn", x, w1) + b1[None, None, :]
    h = h - x
    out = jnp.einsum("ts,bsn->btn", w2, h)
    return jnp.maximum(out, 0.0)


if __name__ == "__main__":
    B = 2
    num_state = 32   # S
    num_node = 16    # N

    key = jax.random.PRNGKey(0)
    kx, kw1, kb1, kw2 = jax.random.split(key, 4)

    x = jax.random.normal(kx, (B, num_state, num_node), dtype=jnp.float32)

    # Parameter shapes matching the PyTorch module:
    # conv1: Conv1d(num_node, num_node, k=1)           -> weight (N, N), bias (N,)
    # conv2: Conv1d(num_state, num_state, k=1, bias=F) -> weight (S, S)
    bound1 = 1.0 / (num_node ** 0.5)
    w1 = jax.random.uniform(kw1, (num_node, num_node), jnp.float32,
                            minval=-bound1, maxval=bound1)
    b1 = jax.random.uniform(kb1, (num_node,), jnp.float32,
                            minval=-bound1, maxval=bound1)
    bound2 = 1.0 / (num_state ** 0.5)
    w2 = jax.random.uniform(kw2, (num_state, num_state), jnp.float32,
                            minval=-bound2, maxval=bound2)

    out = gcn_forward(x, w1, b1, w2)
    out = jax.block_until_ready(out)

    ref = gcn_reference(x, w1, b1, w2)
    assert out.shape == (B, num_state, num_node)
    # Tolerance slightly loosened: residual/bias are folded into the matmul
    # accumulation, so results differ from the reference at the last-ulp level.
    assert jnp.allclose(out, ref, atol=2e-5, rtol=1e-4), "mismatch vs reference"

    print("KERNEL_OK")
</pallas_src>

<mosaic_0001>
module attributes {stable_mosaic.version = 11 : i64} {
  func.func @gcn_kernel(%arg0: i32, %arg1: memref<64x128xf32, #tpu.memory_space<vmem>>, %arg2: memref<128x128xf32, #tpu.memory_space<vmem>>, %arg3: memref<32x32xf32, #tpu.memory_space<vmem>>, %arg4: memref<32x128xf32, #tpu.memory_space<vmem>>, %arg5: memref<64x128xf32, #tpu.memory_space<vmem>>) attributes {dimension_semantics = [#tpu.dimension_semantics<parallel>], iteration_bounds = array<i64: 1>, scalar_prefetch = 0 : i64, scratch_operands = 0 : i64, tpu.core_type = #tpu.core_type<tc>, window_params = [{transform_indices = @transform_0, window_bounds = array<i64: 64, 128>}, {pipeline_mode = #tpu.pipeline_mode<synchronous>, transform_indices = @transform_1, window_bounds = array<i64: 128, 128>}, {pipeline_mode = #tpu.pipeline_mode<synchronous>, transform_indices = @transform_2, window_bounds = array<i64: 32, 32>}, {pipeline_mode = #tpu.pipeline_mode<synchronous>, transform_indices = @transform_3, window_bounds = array<i64: 32, 128>}, {transform_indices = @transform_4, window_bounds = array<i64: 64, 128>}]} {
    %c0 = arith.constant 0 : index
    %c0_0 = arith.constant 0 : index
    %0 = vector.load %arg2[%c0, %c0_0] : memref<128x128xf32, #tpu.memory_space<vmem>>, vector<128x128xf32>
    %c0_1 = arith.constant 0 : index
    %c0_2 = arith.constant 0 : index
    %1 = vector.load %arg3[%c0_1, %c0_2] : memref<32x32xf32, #tpu.memory_space<vmem>>, vector<32x32xf32>
    %c0_3 = arith.constant 0 : index
    %c0_4 = arith.constant 0 : index
    %2 = vector.load %arg4[%c0_3, %c0_4] : memref<32x128xf32, #tpu.memory_space<vmem>>, vector<32x128xf32>
    %c0_5 = arith.constant 0 : index
    %c0_6 = arith.constant 0 : index
    %3 = vector.load %arg1[%c0_5, %c0_6] : memref<64x128xf32, #tpu.memory_space<vmem>>, vector<64x128xf32>
    %cst = arith.constant dense<0.000000e+00> : vector<64x128xf32>
    %4 = tpu.matmul %3, %0, %cst {dimension_numbers = #tpu.dot_dimension_numbers<[1], [0], [0], [1], [0, 0, 1, 1], [], []>} : vector<64x128xf32>, vector<128x128xf32>, vector<64x128xf32> -> vector<64x128xf32>
    %5 = vector.extract_strided_slice %4 {offsets = [0, 0], sizes = [32, 128], strides = [1, 1]} : vector<64x128xf32> to vector<32x128xf32>
    %cst_7 = arith.constant dense<0.000000e+00> : vector<32x128xf32>
    %6 = tpu.matmul %1, %5, %cst_7 {dimension_numbers = #tpu.dot_dimension_numbers<[1], [0], [0], [1], [0, 0, 1, 1], [], []>} : vector<32x32xf32>, vector<32x128xf32>, vector<32x128xf32> -> vector<32x128xf32>
    %7 = arith.addf %6, %2 : vector<32x128xf32>
    %cst_8 = arith.constant 0.000000e+00 : f32
    %8 = vector.broadcast %cst_8 : f32 to vector<32x128xf32>
    %9 = arith.maximumf %7, %8 : vector<32x128xf32>
    %c0_9 = arith.constant 0 : index
    %c0_10 = arith.constant 0 : index
    %10 = vector.load %arg5[%c0_9, %c0_10] : memref<64x128xf32, #tpu.memory_space<vmem>>, vector<32x128xf32>
    tpu.vector_store %arg5[%c0_9, %c0_10], %9 {strides = array<i32>} : memref<64x128xf32, #tpu.memory_space<vmem>>, vector<32x128xf32>,
    %11 = vector.extract_strided_slice %4 {offsets = [32, 0], sizes = [32, 128], strides = [1, 1]} : vector<64x128xf32> to vector<32x128xf32>
    %cst_11 = arith.constant dense<0.000000e+00> : vector<32x128xf32>
    %12 = tpu.matmul %1, %11, %cst_11 {dimension_numbers = #tpu.dot_dimension_numbers<[1], [0], [0], [1], [0, 0, 1, 1], [], []>} : vector<32x32xf32>, vector<32x128xf32>, vector<32x128xf32> -> vector<32x128xf32>
    %13 = arith.addf %12, %2 : vector<32x128xf32>
    %cst_12 = arith.constant 0.000000e+00 : f32
    %14 = vector.broadcast %cst_12 : f32 to vector<32x128xf32>
    %15 = arith.maximumf %13, %14 : vector<32x128xf32>
    %c32 = arith.constant 32 : index
    %c0_13 = arith.constant 0 : index
    %16 = vector.load %arg5[%c32, %c0_13] : memref<64x128xf32, #tpu.memory_space<vmem>>, vector<32x128xf32>
    tpu.vector_store %arg5[%c32, %c0_13], %15 {strides = array<i32>} : memref<64x128xf32, #tpu.memory_space<vmem>>, vector<32x128xf32>,
    return
  }
  func.func @transform_0(%arg0: i32) -> (i32, i32) {
    %c0_i32 = arith.constant 0 : i32
    %c0_i32_0 = arith.constant 0 : i32
    return %arg0, %c0_i32 : i32, i32
  }
  func.func @transform_1(%arg0: i32) -> (i32, i32) {
    %c0_i32 = arith.constant 0 : i32
    %c0_i32_0 = arith.constant 0 : i32
    %c0_i32_1 = arith.constant 0 : i32
    return %c0_i32, %c0_i32_0 : i32, i32
  }
  func.func @transform_2(%arg0: i32) -> (i32, i32) {
    %c0_i32 = arith.constant 0 : i32
    %c0_i32_0 = arith.constant 0 : i32
    %c0_i32_1 = arith.constant 0 : i32
    return %c0_i32, %c0_i32_0 : i32, i32
  }
  func.func @transform_3(%arg0: i32) -> (i32, i32) {
    %c0_i32 = arith.constant 0 : i32
    %c0_i32_0 = arith.constant 0 : i32
    %c0_i32_1 = arith.constant 0 : i32
    return %c0_i32, %c0_i32_0 : i32, i32
  }
  func.func @transform_4(%arg0: i32) -> (i32, i32) {
    %c0_i32 = arith.constant 0 : i32
    %c0_i32_0 = arith.constant 0 : i32
    return %arg0, %c0_i32 : i32, i32
  }
}

</mosaic_0001>

<bundles_post_ra>
// kernel: tpu_custom_call.1
= control target key start
LH: loop header
LB: loop body
LE: loop exit
PB: predicated region body
PF: predicated region fallthrough
CT: control target
= control target key end

     0   :  { %9 = vsyncpa [#allocation3], 0  ;;  %s850_s0 = inlined_call_operand.hbm [shape: f32[64,128], index: 0, kind: input, shape index: {}]   ;;  %s851_s1 = inlined_call_operand.hbm [shape: f32[128,128], index: 1, kind: input, shape index: {}]   ;;  %s852_s2 = inlined_call_operand.hbm [shape: f32[32,32], index: 2, kind: input, shape index: {}]   ;;  %s853_s3 = inlined_call_operand.hbm [shape: f32[32,128], index: 3, kind: input, shape index: {}]   ;;  %s854_s4 = inlined_call_operand.hbm [shape: f32[64,128], index: 4, kind: output, shape index: {}]  }
   0x1   :  { %10 = vsyncpa [#allocation6], 0 }
   0x2   :  { %11 = vsyncpa [#allocation9], 0 }
   0x3   :  { %12 = vsyncpa [#allocation4], 0  ;;  %s721_s15 = smov [#allocation5]   ;;  %s722_s17 = smov [#allocation2]  }
   0x4   :  { %s30_s16 = sshll.u32 %s721_s15, 4  ;;  %s18_s18 = sshll.u32 %s722_s17, 4  ;;  %s31_s16 = int_to_ptr.vmem [resolvable:$true] %s30_s16  ;;  %s753_s18 = int_to_ptr.vmem [resolvable:$true] %s18_s18 }
   0x5   :  { %s603_s21 = scalar_lea.hbm %s851_s1, 2048 }
   0x6   :  { %p604_p0 = scmp.ne.s32.totalorder %s851_s1, %s603_s21  ;;  %p607_p1 = scmp.lt.u32.totalorder %s603_s21, %s851_s1 }
   0x8   :  { %p609_p2 = pnand %p607_p1, %p604_p0 }
   0xa   :  { %612 = shalt.err (!%p609_p2)
}
   0xb   :  { %s613_s26 = scalar_lea.vmem %s31_s16, 2048  ;;  %p618_p4 = scmp.lt.s32.totalorder %s31_s16, %s31_s16 }
   0xc   :  { %p614_p3 = scmp.ne.s32.totalorder %s31_s16, %s613_s26  ;;  %p619_p5 = scmp.lt.s32.totalorder %s613_s26, %s613_s26 }
   0xe   :  { %p620_p6 = por %p619_p5, %p618_p4 }
  0x10   :  { %p621_p7 = pnand %p620_p6, %p614_p3 }
  0x12   :  { %624 = shalt.err (!%p621_p7)
}
  0x13   :  { %s723_s27 = smov 128   ;;  %s724_s28 = smov 8  }
  0x14   :  { %36 = dma.hbm_to_vmem [thread:$0]  %s851_s1, 2048, %s31_s16, [#allocation6], %s723_s27, %s723_s27, %s724_s28  }
  0x15   :  { %s625_s7 = scalar_lea.hbm %s850_s0, 1024 }
  0x16   :  { %p626_p8 = scmp.ne.s32.totalorder %s850_s0, %s625_s7  ;;  %p629_p9 = scmp.lt.u32.totalorder %s625_s7, %s850_s0 }
  0x18   :  { %p631_p10 = pnand %p629_p9, %p626_p8 }
  0x1a   :  { %634 = shalt.err (!%p631_p10)
}
  0x1b   :  { %s635_s12 = scalar_lea.vmem %s753_s18, 1024  ;;  %p640_p12 = scmp.lt.s32.totalorder %s753_s18, %s753_s18 }
  0x1c   :  { %p636_p11 = scmp.ne.s32.totalorder %s753_s18, %s635_s12  ;;  %p641_p13 = scmp.lt.s32.totalorder %s635_s12, %s635_s12 }
  0x1e   :  { %p642_p0 = por %p641_p13, %p640_p12 }
  0x20   :  { %p643_p1 = pnand %p642_p0, %p636_p11 }
  0x22   :  { %646 = shalt.err (!%p643_p1)
}
  0x23   :  { %24 = dma.hbm_to_vmem [thread:$0]  %s850_s0, 1024, %s753_s18, [#allocation3], %s723_s27, %s723_s27, %s724_s28  }
  0x24   :  { %s725_s14 = smov [#allocation7]   ;;  %s726_s16 = smov [#allocation8]  }
  0x25   :  { %s42_s15 = sshll.u32 %s725_s14, 4  ;;  %s54_s17 = sshll.u32 %s726_s16, 4  ;;  %s43_s15 = int_to_ptr.vmem [resolvable:$true] %s42_s15  ;;  %s790_s17 = int_to_ptr.vmem [resolvable:$true] %s54_s17 }
  0x26   :  { %s647_s21 = scalar_lea.hbm %s852_s2, 512 }
  0x27   :  { %p648_p2 = scmp.ne.s32.totalorder %s852_s2, %s647_s21  ;;  %p651_p3 = scmp.lt.u32.totalorder %s647_s21, %s852_s2 }
  0x29   :  { %p653_p4 = pnand %p651_p3, %p648_p2 }
  0x2b   :  { %656 = shalt.err (!%p653_p4)
}
  0x2c   :  { %s657_s0 = scalar_lea.vmem %s43_s15, 512  ;;  %p662_p6 = scmp.lt.s32.totalorder %s43_s15, %s43_s15 }
  0x2d   :  { %p658_p5 = scmp.ne.s32.totalorder %s43_s15, %s657_s0  ;;  %p663_p7 = scmp.lt.s32.totalorder %s657_s0, %s657_s0 }
  0x2f   :  { %p664_p8 = por %p663_p7, %p662_p6 }
  0x31   :  { %p665_p9 = pnand %p664_p8, %p658_p5 }
  0x33   :  { %668 = shalt.err (!%p665_p9)
}
  0x34   :  { %48 = dma.hbm_to_vmem [thread:$0]  %s852_s2, 512, %s43_s15, [#allocation6], %s723_s27, %s723_s27, %s724_s28  }
  0x35   :  { %s669_s5 = scalar_lea.hbm %s853_s3, 512 }
  0x36   :  { %p670_p10 = scmp.ne.s32.totalorder %s853_s3, %s669_s5  ;;  %p673_p11 = scmp.lt.u32.totalorder %s669_s5, %s853_s3 }
  0x38   :  { %p675_p12 = pnand %p673_p11, %p670_p10 }
  0x3a   :  { %678 = shalt.err (!%p675_p12)
}
  0x3b   :  { %s679_s10 = scalar_lea.vmem %s790_s17, 512  ;;  %p684_p0 = scmp.lt.s32.totalorder %s790_s17, %s790_s17 }
  0x3c   :  { %p680_p13 = scmp.ne.s32.totalorder %s790_s17, %s679_s10  ;;  %p685_p1 = scmp.lt.s32.totalorder %s679_s10, %s679_s10 }
  0x3e   :  { %p686_p2 = por %p685_p1, %p684_p0 }
  0x40   :  { %p687_p3 = pnand %p686_p2, %p680_p13 }
  0x42   :  { %690 = shalt.err (!%p687_p3)
}
  0x43   :  { %60 = dma.hbm_to_vmem [thread:$0]  %s853_s3, 512, %s790_s17, [#allocation9], %s723_s27, %s723_s27, %s724_s28  }
  0x44   :  { %713 = dma.done.wait [#allocation3], 1024  }
  0x45   :  { %714 = vsyncadd [#allocation3], 4294966272 }
  0x46   :  { %715 = dma.done.wait [#allocation6], 2560  }
  0x47   :  { %716 = vsyncadd [#allocation6], 4294964736 }
  0x48   :  { %717 = dma.done.wait [#allocation9], 512  }
  0x49   :  { %718 = vsyncadd [#allocation9], 4294966784  ;;  %v73_v0 = vld [vmem:[#allocation5] sm:$0xff]  ;;  %v74_v1 = vld [vmem:[#allocation5 + $0x8] sm:$0xff]  ;;  %vm210_vm0 = vcmask 261120   ;;  %s727_s3 = smov [#allocation10]  }
  0x4a   :  { %v75_v2 = vld [vmem:[#allocation5 + $0x10] sm:$0xff]  ;;  %v548_v3 = vpack.c.bf16 %v74_v1, %v73_v0  ;;  %v76_v4 = vld [vmem:[#allocation5 + $0x18] sm:$0xff]  ;;  %v77_v6 = vld [vmem:[#allocation5 + $0x20] sm:$0xff]  ;;  %s414_s12 = sshll.u32 %s727_s3, 4  ;;  %s415_s12 = int_to_ptr.vmem [resolvable:$true] %s414_s12 }
  0x4b   :  { %v552_v5 = vpack.c.bf16 %v76_v4, %v75_v2  ;;  %v78_v7 = vld [vmem:[#allocation5 + $0x28] sm:$0xff]  ;;  %v97_v9 = vld [vmem:[#allocation2] sm:$0xff]  ;;  %v79_v10 = vld [vmem:[#allocation5 + $0x30] sm:$0xff]  ;;  %s691_s1 = scalar_lea.vmem %s415_s12, 1024  ;;  %p696_p5 = scmp.lt.s32.totalorder %s415_s12, %s415_s12 }
  0x4c   :  { %549 = vmatprep.subr.bf16.mxu0 %v548_v3  ;;  %v556_v8 = vpack.c.bf16 %v78_v7, %v77_v6  ;;  %v80_v11 = vld [vmem:[#allocation5 + $0x38] sm:$0xff]  ;;  %508 = vmatprep.mubr.f32.mxu0 %v97_v9  ;;  %v81_v13 = vld [vmem:[#allocation5 + $0x40] sm:$0xff]  ;;  %v82_v14 = vld [vmem:[#allocation5 + $0x48] sm:$0xff]  ;;  %p692_p4 = scmp.ne.s32.totalorder %s415_s12, %s691_s1  ;;  %p697_p6 = scmp.lt.s32.totalorder %s691_s1, %s691_s1 }
  0x4d   :  { %551 = vmatpush3.bf16.msra.mxu0 %v548_v3  ;;  %v560_v12 = vpack.c.bf16 %v80_v11, %v79_v10  ;;  %v564_v15 = vpack.c.bf16 %v82_v14, %v81_v13  ;;  %v83_v16 = vld [vmem:[#allocation5 + $0x50] sm:$0xff]  ;;  %v84_v17 = vld [vmem:[#allocation5 + $0x58] sm:$0xff]  ;;  %v85_v19 = vld [vmem:[#allocation5 + $0x60] sm:$0xff] }
  0x4e   :  { %553 = vmatprep.subr.bf16.mxu0 %v552_v5  ;;  %v568_v18 = vpack.c.bf16 %v84_v17, %v83_v16  ;;  %v86_v20 = vld [vmem:[#allocation5 + $0x68] sm:$0xff]  ;;  %v87_v22 = vld [vmem:[#allocation5 + $0x70] sm:$0xff]  ;;  %v88_v23 = vld [vmem:[#allocation5 + $0x78] sm:$0xff]  ;;  %p698_p7 = por %p697_p6, %p696_p5 }
  0x4f   :  { %v572_v21 = vpack.c.bf16 %v86_v20, %v85_v19  ;;  %v576_v24 = vpack.c.bf16 %v88_v23, %v87_v22  ;;  %v98_v25 = vld [vmem:[#allocation2 + $0x8] sm:$0xff]  ;;  %v99_v26 = vld [vmem:[#allocation2 + $0x10] sm:$0xff]  ;;  %v100_v27 = vld [vmem:[#allocation2 + $0x18] sm:$0xff] }
  0x50   :  { %v101_v28 = vld [vmem:[#allocation2 + $0x20] sm:$0xff]  ;;  %v102_v29 = vld [vmem:[#allocation2 + $0x28] sm:$0xff]  ;;  %v103_v30 = vld [vmem:[#allocation2 + $0x30] sm:$0xff]  ;;  %p699_p8 = pnand %p698_p7, %p692_p4 }
  0x51   :  { %555 = vmatpush3.bf16.msra.mxu0 %v552_v5  ;;  %v104_v31 = vld [vmem:[#allocation2 + $0x38] sm:$0xff]  ;;  %v89_v32 = vld [vmem:[#allocation7] sm:$0xff]  ;;  %v90_v41 = vld [vmem:[#allocation7 + $0x8] sm:$0xff] }
  0x52   :  { %557 = vmatprep.subr.bf16.mxu0 %v556_v8  ;;  %528 = vmatprep.mubr.msk.f32.mxu1 %vm210_vm0, %v89_v32  ;;  %v91_v43 = vld [vmem:[#allocation7 + $0x10] sm:$0xff]  ;;  %v92_v46 = vld [vmem:[#allocation7 + $0x18] sm:$0xff]  ;;  %v94_v48 = vld [vmem:[#allocation8 + $0x8] sm:$0xff] }
  0x53   :  { %v93_v49 = vld [vmem:[#allocation8] sm:$0xff]  ;;  %v96_v54 = vld [vmem:[#allocation8 + $0x18] sm:$0xff]  ;;  %v95_v56 = vld [vmem:[#allocation8 + $0x10] sm:$0xff] }
  0x55   :  { %559 = vmatpush3.bf16.msra.mxu0 %v556_v8 }
  0x56   :  { %561 = vmatprep.subr.bf16.mxu0 %v560_v12 }
  0x59   :  { %563 = vmatpush3.bf16.msra.mxu0 %v560_v12 }
  0x5a   :  { %565 = vmatprep.subr.bf16.mxu0 %v564_v15 }
  0x5d   :  { %567 = vmatpush3.bf16.msra.mxu0 %v564_v15 }
  0x5e   :  { %569 = vmatprep.subr.bf16.mxu0 %v568_v18 }
  0x61   :  { %571 = vmatpush3.bf16.msra.mxu0 %v568_v18 }
  0x62   :  { %573 = vmatprep.subr.bf16.mxu0 %v572_v21 }
  0x65   :  { %575 = vmatpush3.bf16.msra.mxu0 %v572_v21 }
  0x66   :  { %577 = vmatprep.subr.bf16.mxu0 %v576_v24 }
  0x69   :  { %579 = vmatpush3.bf16.msra.mxu0 %v576_v24 }
  0x6c   :  { %509 = vmatmul.mubr.f32.vlgmr.msra.gmra.mrb[0].mxu0 %v98_v25 }
  0x6d   :  { %511 = vmatprep.mubr.f32.mxu0 %v99_v26 }
  0x70   :  { %512 = vmatmul.mubr.f32.gmra.mrb[2].mxu0 %v100_v27 }
  0x71   :  { %514 = vmatprep.mubr.f32.mxu0 %v101_v28 }
  0x74   :  { %515 = vmatmul.mubr.f32.gmra.mrb[4].mxu0 %v102_v29 }
  0x75   :  { %517 = vmatprep.mubr.f32.mxu0 %v103_v30 }
  0x78   :  { %518 = vmatmul.mubr.f32.gmra.mrb[6].mxu0 %v104_v31 }
 0x13f   :  { %v510_v33 = vpop.f32.mrb[0].mxu0 }
 0x140   :  { %v171_v34 = vpop.f32.mrb[1].mxu0 }
 0x141   :  { %v580_v35 = vpack.c.bf16 %v510_v33, %v171_v34 }
 0x143   :  { %v513_v36 = vpop.f32.mrb[2].mxu0  ;;  %581 = vmatprep.subr.bf16.mxu1 %v580_v35 }
 0x144   :  { %v181_v37 = vpop.f32.mrb[3].mxu0  ;;  %583 = vmatpush3.bf16.msra.mxu1 %v580_v35 }
 0x145   :  { %v584_v38 = vpack.c.bf16 %v513_v36, %v181_v37 }
 0x147   :  { %v516_v39 = vpop.f32.mrb[4].mxu0  ;;  %585 = vmatprep.subr.bf16.mxu1 %v584_v38 }
 0x148   :  { %v191_v40 = vpop.f32.mrb[5].mxu0  ;;  %587 = vmatpush3.bf16.msra.mxu1 %v584_v38 }
 0x149   :  { %v588_v42 = vpack.c.bf16 %v516_v39, %v191_v40 }
 0x14b   :  { %v519_v44 = vpop.f32.mrb[6].mxu0  ;;  %529 = vmatmul.mubr.msk.f32.vlgmr.msra.gmra.mrb[0].mxu1 %vm210_vm0, %v90_v41  ;;  %589 = vmatprep.subr.bf16.mxu1 %v588_v42 }
 0x14c   :  { %v201_v45 = vpop.f32.mrb[7].mxu0  ;;  %591 = vmatpush3.bf16.msra.mxu1 %v588_v42  ;;  %531 = vmatprep.mubr.msk.f32.mxu1 %vm210_vm0, %v91_v43 }
 0x14d   :  { %v592_v47 = vpack.c.bf16 %v519_v44, %v201_v45 }
 0x14f   :  { %532 = vmatmul.mubr.msk.f32.gmra.mrb[2].mxu1 %vm210_vm0, %v92_v46  ;;  %593 = vmatprep.subr.bf16.mxu1 %v592_v47 }
 0x150   :  { %595 = vmatpush3.bf16.msra.mxu1 %v592_v47  ;;  %542 = vmatprep.mubr.msk.f32.mxu1 %vm210_vm0, %v89_v32 }
 0x153   :  { %543 = vmatmul.mubr.msk.f32.vlgmr.msra.gmra.mrb[4].mxu1 %vm210_vm0, %v90_v41 }
 0x154   :  { %545 = vmatprep.mubr.msk.f32.mxu1 %vm210_vm0, %v91_v43 }
 0x157   :  { %546 = vmatmul.mubr.msk.f32.gmra.mrb[6].mxu1 %vm210_vm0, %v92_v46 }
 0x21e   :  { %v530_v50 = vpop.f32.mrb[0].mxu1 }
 0x21f   :  { %v295_v51 = vadd.f32 %v530_v50, %v94_v48  ;;  %v289_v52 = vpop.f32.mrb[1].mxu1 }
 0x220   :  { %v290_v53 = vadd.f32 %v289_v52, %v93_v49 }
 0x221   :  { %v309_v55 = vmax.f32 %v295_v51, 0.0 }
 0x222   :  { %v308_v57 = vmax.f32 %v290_v53, 0.0  ;;  %v533_v58 = vpop.f32.mrb[2].mxu1 }
 0x223   :  { %313 = vst [vmem:[#allocation10 + $0x8] sm:$0xff] %v309_v55  ;;  %v305_v59 = vadd.f32 %v533_v58, %v96_v54  ;;  %v299_v60 = vpop.f32.mrb[3].mxu1 }
 0x224   :  { %312 = vst [vmem:[#allocation10] sm:$0xff] %v308_v57  ;;  %v300_v61 = vadd.f32 %v299_v60, %v95_v56 }
 0x225   :  { %v311_v62 = vmax.f32 %v305_v59, 0.0 }
 0x226   :  { %v310_v63 = vmax.f32 %v300_v61, 0.0  ;;  %v544_v0 = vpop.f32.mrb[4].mxu1 }
 0x227   :  { %315 = vst [vmem:[#allocation10 + $0x18] sm:$0xff] %v311_v62  ;;  %v388_v1 = vadd.f32 %v544_v0, %v94_v48  ;;  %v382_v2 = vpop.f32.mrb[5].mxu1 }
 0x228   :  { %314 = vst [vmem:[#allocation10 + $0x10] sm:$0xff] %v310_v63  ;;  %v383_v3 = vadd.f32 %v382_v2, %v93_v49 }
 0x229   :  { %v402_v4 = vmax.f32 %v388_v1, 0.0 }
 0x22a   :  { %v401_v5 = vmax.f32 %v383_v3, 0.0  ;;  %v547_v6 = vpop.f32.mrb[6].mxu1 }
 0x22b   :  { %406 = vst [vmem:[#allocation10 + $0x28] sm:$0xff] %v402_v4  ;;  %v398_v7 = vadd.f32 %v547_v6, %v96_v54  ;;  %v392_v8 = vpop.f32.mrb[7].mxu1 }
 0x22c   :  { %405 = vst [vmem:[#allocation10 + $0x20] sm:$0xff] %v401_v5  ;;  %v393_v9 = vadd.f32 %v392_v8, %v95_v56 }
 0x22d   :  { %v404_v10 = vmax.f32 %v398_v7, 0.0 }
 0x22e   :  { %v403_v11 = vmax.f32 %v393_v9, 0.0 }
 0x22f   :  { %408 = vst [vmem:[#allocation10 + $0x38] sm:$0xff] %v404_v10 }
 0x230   :  { %407 = vst [vmem:[#allocation10 + $0x30] sm:$0xff] %v403_v11 }
 0x231   :  { %702 = shalt.err (!%p699_p8)
}
 0x232   :  { %s703_s15 = scalar_lea.hbm %s854_s4, 1024 }
 0x233   :  { %p704_p9 = scmp.ne.s32.totalorder %s854_s4, %s703_s15  ;;  %p707_p10 = scmp.lt.u32.totalorder %s703_s15, %s854_s4 }
 0x235   :  { %p709_p11 = pnand %p707_p10, %p704_p9 }
 0x237   :  { %712 = shalt.err (!%p709_p11)
}
 0x238   :  { %420 = dma.vmem_to_hbm [thread:$0]  %s415_s12, 1024, %s854_s4, [#allocation4], %s723_s27, %s723_s27, %s724_s28  }
 0x239   :  { %719 = dma.done.wait [#allocation4], 1024  }
 0x23a   :  { %720 = vsyncadd [#allocation4], 4294966272 }
 0x23b   :  { %424 = vsyncpa [#allocation3], 1 }
 0x23c   :  { %425 = vsyncpa [#allocation6], 1 }
 0x23d   :  { %426 = vsyncpa [#allocation9], 1 }
 0x23e   :  { %427 = vsyncpa [#allocation4], 1 }

</bundles_post_ra>
